<compile_context>
chip_gen: v7x
topology: tpu7x:2x2x1
jax: 0.10.0
libtpu: 0.0.40
codegen_flags: <defaults>
</compile_context>

<pallas_src>
import jax
import jax.numpy as jnp
from jax import lax
from jax.experimental import pallas as pl
from jax.experimental.pallas import tpu as pltpu


# --------------------------------------------------------------------------
# helpers
# --------------------------------------------------------------------------

def _row_tile(n_rows, max_tile=512):
    """Largest tile from a fixed menu that divides n_rows (multiples of 8 for the TPU sublane
    tiling); falls back to a single full-extent block, which is always a legal block shape."""
    for t in (512, 256, 128, 64, 32, 16, 8):
        if t <= max_tile and n_rows % t == 0:
            return t
    return n_rows


# --------------------------------------------------------------------------
# general path: explicit position_ids  ->  DMA row gather
# --------------------------------------------------------------------------

def _gather_kernel(ids_ref, table_hbm, out_ref, gather_buf, copy_sem):
    """ids_ref:    SMEM (M,) int32 (scalar-prefetched flattened position ids)
       table_hbm:  (max_pos, E) embedding table, left in HBM (memory_space=pl.ANY)
       out_ref:    (TM, E) VMEM output block for this grid step
       gather_buf: (TM, E) VMEM scratch the row DMAs land in
       copy_sem:   (1,) DMA semaphore shared by all row copies of this step
    """
    tm = out_ref.shape[0]
    base = pl.program_id(0) * tm

    def _start(i, carry):
        row = ids_ref[base + i]
        pltpu.make_async_copy(
            table_hbm.at[pl.ds(row, 1), :],
            gather_buf.at[pl.ds(i, 1), :],
            copy_sem.at[0],
        ).start()
        return carry

    lax.fori_loop(0, tm, _start, 0)

    def _wait(i, carry):
        row = ids_ref[base + i]
        pltpu.make_async_copy(
            table_hbm.at[pl.ds(row, 1), :],
            gather_buf.at[pl.ds(i, 1), :],
            copy_sem.at[0],
        ).wait()
        return carry

    lax.fori_loop(0, tm, _wait, 0)

    out_ref[...] = gather_buf[...]


def _gather_positional_encoding(pe_table, position_ids):
    """pe_table: (max_pos, E), position_ids: (B, S) int -> (B, S, E)."""
    B, S = position_ids.shape
    max_pos, E = pe_table.shape
    M = B * S

    # Out-of-range ids would raise in PyTorch's nn.Embedding; here they would be an
    # out-of-bounds DMA, so clamp defensively (in-range ids are unaffected).
    ids = jnp.clip(position_ids.reshape(M).astype(jnp.int32), 0, max_pos - 1)

    tm = _row_tile(M, max_tile=256)   # bound in-flight DMAs / VMEM per step
    grid = (M // tm,)

    out = pl.pallas_call(
        _gather_kernel,
        out_shape=jax.ShapeDtypeStruct((M, E), pe_table.dtype),
        grid_spec=pltpu.PrefetchScalarGridSpec(
            num_scalar_prefetch=1,
            grid=grid,
            in_specs=[pl.BlockSpec(memory_space=pl.ANY)],        # table stays in HBM
            out_specs=pl.BlockSpec((tm, E), lambda i, ids_s: (i, 0)),
            scratch_shapes=[
                pltpu.VMEM((tm, E), pe_table.dtype),
                pltpu.SemaphoreType.DMA((1,)),
            ],
        ),
        compiler_params=pltpu.CompilerParams(
            dimension_semantics=("arbitrary",)),
    )(ids, pe_table)

    return out.reshape(B, S, E)


# --------------------------------------------------------------------------
# default path: position_ids is None  ->  out = pe_table[:seq_length] (contiguous copy)
# --------------------------------------------------------------------------

def _copy_kernel(src_ref, out_ref):
    out_ref[...] = src_ref[...]


def _default_positional_encoding(pe_table, seq_length):
    max_pos, E = pe_table.shape
    S = seq_length
    dtype = pe_table.dtype

    # The copy path needs a legal row-block (multiple of 8 rows or the full table);
    # otherwise fall back to the DMA gather with arange ids.
    if not (S % 8 == 0 or S == max_pos):
        ids = jnp.arange(S, dtype=jnp.int32)[None, :]
        return _gather_positional_encoding(pe_table, ids)

    # Lane-dense view: the first S rows are contiguous, so (S, E) row-major is bit-identical
    # to (S*E//128, 128).  Use it when the slab is a whole number of (8, 128) f32 tiles so
    # every store is an unmasked, full-lane vst.
    if E < 128 and (S * E) % (8 * 128) == 0 and (max_pos * E) % 128 == 0:
        src = pe_table.reshape(max_pos * E // 128, 128)
        rows, tile_e = S * E // 128, 128
    else:
        src, rows, tile_e = pe_table, S, E

    tm = _row_tile(rows)
    grid = (rows // tm,)

    out = pl.pallas_call(
        _copy_kernel,
        out_shape=jax.ShapeDtypeStruct((rows, tile_e), dtype),
        grid=grid,
        in_specs=[pl.BlockSpec((tm, tile_e), lambda i: (i, 0))],
        out_specs=pl.BlockSpec((tm, tile_e), lambda i: (i, 0)),
        compiler_params=pltpu.CompilerParams(
            dimension_semantics=("parallel",)),   # rows split across TCs on v7x
    )(src)

    return out.reshape(1, S, E)


# --------------------------------------------------------------------------
# module forward
# --------------------------------------------------------------------------

def learned_positional_encoding_forward(pe_table, seq_length, x, position_ids=None):
    """Matches LearnedPositionalEncoding.forward(x, position_ids=None).

    pe_table:   (max_position_embeddings, embedding_dim) f32 embedding weight
    seq_length: int (length of the registered position_ids buffer)
    x:          unused by the computation (kept for signature parity)
    returns:    (1, seq_length, E) if position_ids is None, else (B, S, E).
    """
    del x  # the reference forward never reads x
    if position_ids is None:
        return _default_positional_encoding(pe_table, seq_length)
    return _gather_positional_encoding(pe_table, position_ids)


# --------------------------------------------------------------------------
# main
# --------------------------------------------------------------------------

if __name__ == "__main__":
    # LearnedPositionalEncoding(max_position_embeddings=64, embedding_dim=32, seq_length=8)
    MAX_POS, E, SEQ = 64, 32, 8
    N = 2  # batch of the (ignored) x input

    key = jax.random.PRNGKey(0)
    k_pe, k_x, k_ids = jax.random.split(key, 3)

    pe_table = 0.05 * jax.random.normal(k_pe, (MAX_POS, E), jnp.float32)
    x = jax.random.normal(k_x, (N, SEQ, E), jnp.float32)

    # --- default path (position_ids=None): contiguous slice copy kernel ---
    out = learned_positional_encoding_forward(pe_table, SEQ, x)
    out = jax.block_until_ready(out)
    assert out.shape == (1, SEQ, E), out.shape
    assert bool(jnp.all(jnp.isfinite(out)))
    ref = pe_table[:SEQ][None, :, :]
    assert bool(jnp.allclose(out, ref, atol=1e-6, rtol=1e-6))

    # --- explicit position_ids path: scalar-prefetch DMA gather kernel ---
    pos_ids = jax.random.randint(k_ids, (N, SEQ), 0, MAX_POS, dtype=jnp.int32)
    out2 = learned_positional_encoding_forward(pe_table, SEQ, x, position_ids=pos_ids)
    out2 = jax.block_until_ready(out2)
    assert out2.shape == (N, SEQ, E), out2.shape
    ref2 = pe_table[pos_ids]
    assert bool(jnp.allclose(out2, ref2, atol=1e-6, rtol=1e-6))

    print("KERNEL_OK")
</pallas_src>

<mosaic_0001>
module attributes {stable_mosaic.version = 11 : i64} {
  func.func @_copy_kernel(%arg0: i32, %arg1: memref<8x32xf32, #tpu.memory_space<vmem>>, %arg2: memref<8x32xf32, #tpu.memory_space<vmem>>) attributes {dimension_semantics = [#tpu.dimension_semantics<parallel>], iteration_bounds = array<i64: 1>, scalar_prefetch = 0 : i64, scratch_operands = 0 : i64, tpu.core_type = #tpu.core_type<tc>, window_params = [{transform_indices = @transform_0, window_bounds = array<i64: 8, 32>}, {transform_indices = @transform_1, window_bounds = array<i64: 8, 32>}]} {
    %c0 = arith.constant 0 : index
    %c0_0 = arith.constant 0 : index
    %0 = vector.load %arg1[%c0, %c0_0] : memref<8x32xf32, #tpu.memory_space<vmem>>, vector<8x32xf32>
    %c0_1 = arith.constant 0 : index
    %c0_2 = arith.constant 0 : index
    %1 = vector.load %arg2[%c0_1, %c0_2] : memref<8x32xf32, #tpu.memory_space<vmem>>, vector<8x32xf32>
    tpu.vector_store %arg2[%c0_1, %c0_2], %0 {strides = array<i32>} : memref<8x32xf32, #tpu.memory_space<vmem>>, vector<8x32xf32>,
    return
  }
  func.func @transform_0(%arg0: i32) -> (i32, i32) {
    %c0_i32 = arith.constant 0 : i32
    %c0_i32_0 = arith.constant 0 : i32
    return %arg0, %c0_i32 : i32, i32
  }
  func.func @transform_1(%arg0: i32) -> (i32, i32) {
    %c0_i32 = arith.constant 0 : i32
    %c0_i32_0 = arith.constant 0 : i32
    return %arg0, %c0_i32 : i32, i32
  }
}

</mosaic_0001>

<bundles_post_ra>
// kernel: tpu_custom_call.1
= control target key start
LH: loop header
LB: loop body
LE: loop exit
PB: predicated region body
PF: predicated region fallthrough
CT: control target
= control target key end

     0   :  { %vm10_vm0 = vcmask 261120   ;;  %s77_s0 = inlined_call_operand.vmem [shape: f32[64,32], index: 0, kind: input, shape index: {}]   ;;  %s78_s1 = inlined_call_operand.hbm [shape: f32[8,32], index: 1, kind: output, shape index: {}]  }
   0x1   :  { %v9_v0 = vld [vmem:[%s77_s0] sm:$0xff] }
   0x2   :  { %6 = vsyncpa [#allocation3], 0  ;;  %11 = vst.msk [vmem:[#allocation2] sm:$0xff] %vm10_vm0, %v9_v0  ;;  %s51_s8 = smov [#allocation2]  }
   0x3   :  { %s18_s9 = sshll.u32 %s51_s8, 4  ;;  %s19_s9 = int_to_ptr.vmem [resolvable:$true] %s18_s9 }
   0x4   :  { %s27_s10 = scalar_lea.vmem %s19_s9, 128  ;;  %p32_p1 = scmp.lt.s32.totalorder %s19_s9, %s19_s9 }
   0x5   :  { %p28_p0 = scmp.ne.s32.totalorder %s19_s9, %s27_s10  ;;  %p33_p2 = scmp.lt.s32.totalorder %s27_s10, %s27_s10 }
   0x7   :  { %p34_p3 = por %p33_p2, %p32_p1 }
   0x9   :  { %p35_p4 = pnand %p34_p3, %p28_p0 }
   0xb   :  { %38 = shalt.err (!%p35_p4)
}
   0xc   :  { %s39_s13 = scalar_lea.hbm %s78_s1, 128 }
   0xd   :  { %p40_p5 = scmp.ne.s32.totalorder %s78_s1, %s39_s13  ;;  %p43_p6 = scmp.lt.u32.totalorder %s39_s13, %s78_s1 }
   0xf   :  { %p45_p7 = pnand %p43_p6, %p40_p5 }
  0x11   :  { %48 = shalt.err (!%p45_p7)
}
  0x12   :  { %21 = dma.vmem_to_hbm [thread:$0]  %s19_s9, 128, %s78_s1, [#allocation3]  }
  0x13   :  { %49 = dma.done.wait [#allocation3], 128  }
  0x14   :  { %50 = vsyncadd [#allocation3], 4294967168 }
  0x15   :  { %25 = vsyncpa [#allocation3], 1 }

</bundles_post_ra>
